<compile_context>
chip_gen: v5e
topology: v5e:2x2
jax: 0.10.0
libtpu: 0.0.40
codegen_flags: <defaults>
</compile_context>

<pallas_src>
import jax
import jax.numpy as jnp
from jax.experimental import pallas as pl
from jax.experimental.pallas import tpu as pltpu


def _vmem_capacity_bytes():
    """Physical VMEM of the current chip, with a conservative fallback."""
    try:
        info = pltpu.get_tpu_info()
        cap = getattr(info, "vmem_capacity_bytes", None)
        if cap:
            return int(cap)
    except Exception:
        pass
    return 64 << 20  # v7x-conservative default


def _sublane_pack(dtype):
    """Sublane packing factor: 8 (f32), 16 (bf16/f16), 32 (int8/fp8)."""
    return max(8, 32 // jnp.dtype(dtype).itemsize)


def _pick_tile_hw(hw, batch, *, bytes_per_lane, budget_bytes, min_total_steps=4):
    """Largest lane-dense spatial tile that (a) divides H*W, (b) fits the VMEM
    budget, and (c) still leaves >= min_total_steps grid steps (>= 2 per
    TensorCore on v7x) so the pipeline has something to overlap."""
    if hw % 128 != 0:
        # TODO(synk): remainder-tile path (pl.BoundedSlice / masked last tile)
        # for H*W that is not a multiple of 128.
        return hw
    max_fit = max(128, (budget_bytes // max(bytes_per_lane, 1)) // 128 * 128)
    cands = [t for t in range(128, hw + 1, 128) if hw % t == 0 and t <= max_fit]
    if not cands:
        cands = [128]
    good = [t for t in cands if batch * (hw // t) >= min_total_steps]
    if good:
        return max(good)
    # Even the smallest tile cannot reach min_total_steps: maximise step count.
    return min(cands)


def coupling_kernel(x_ref, y_ref,
                    w1x_ref, w1y_ref, b1_ref,
                    w2_ref, b2_ref,
                    z_ref, logs_ref):
    """One (batch, spatial-tile) block of fused F(xa, y) + affine coupling.

    Channels sit on the sublane axis (padded to the sublane pack, so every
    slice below is dense), spatial on the 128-lane axis, so every matmul is
    W^T @ x with spatial as the free (lane) dimension and every store is
    lane- and sublane-dense.
    """
    ca = logs_ref.shape[1]                      # static python int (Ca_pad)

    xc = x_ref[0]                               # (C_pad, T) native dtype
    yc = y_ref[0]                               # (Cy,    T) native dtype
    xa = xc[:ca, :]                             # (Ca_pad, T) passthrough + F input
    xb = xc[ca:, :].astype(jnp.float32)         # (Ca_pad, T) f32 for epilogue

    # F layer 1: h = tanh(W1x^T xa + W1y^T y + b1)  -> (Hd, T), f32 accumulate.
    h = jnp.tanh(
        jnp.dot(w1x_ref[...], xa, preferred_element_type=jnp.float32)
        + jnp.dot(w1y_ref[...], yc, preferred_element_type=jnp.float32)
        + b1_ref[...])
    h = h.astype(w2_ref.dtype)                  # feed MXU in weight dtype

    # F layer 2: ONE fused matmul producing [log_s ; t] stacked on sublanes.
    st = jnp.dot(w2_ref[...], h, preferred_element_type=jnp.float32) + b2_ref[...]
    log_s = st[:ca, :]                          # (Ca_pad, T) dense sublane split
    t = st[ca:, :]                              # (Ca_pad, T)

    # Affine coupling: zb = xb * exp(log_s) + t ; z = [xa ; zb] along channels.
    zb = xb * jnp.exp(log_s) + t                # (Ca_pad, T) f32

    z_ref[0, :ca, :] = xa.astype(z_ref.dtype)   # passthrough half
    z_ref[0, ca:, :] = zb.astype(z_ref.dtype)   # coupled half
    logs_ref[0, :, :] = log_s.astype(logs_ref.dtype)


def affine_coupling_forward(x, y, params, *, tile_hw=None, donate_x=False):
    """Forward of AffineCouplingBlock. x: (B, C, H, W) NCHW, y: (B, Cy, H, W).

    Returns (z, log_s): z (B, C, H, W), log_s (B, C//2, H, W) in x.dtype."""
    B, C, H, W = x.shape
    assert C % 2 == 0, "AffineCouplingBlock requires an even channel count"
    Ca = C // 2
    Cy = y.shape[1]
    HW = H * W
    w1x, w1y, b1, w2, b2 = params
    Hd = w1x.shape[1]

    # --- channel padding so Ca is sublane-aligned (dense slices/stores) ------
    pack = _sublane_pack(x.dtype)
    Ca_pad = ((Ca + pack - 1) // pack) * pack
    pad = Ca_pad - Ca
    C_pad = 2 * Ca_pad

    # --- weight prep (tiny, done once outside the hot loop) ------------------
    w1x_t = w1x.T                                            # (Hd, Ca)
    if pad:
        w1x_t = jnp.pad(w1x_t, ((0, 0), (0, pad)))           # (Hd, Ca_pad)
    w1y_t = w1y.T                                            # (Hd, Cy)
    b1_c = b1.reshape(-1, 1)                                 # (Hd, 1)

    w2s, w2t = w2[:, :Ca], w2[:, Ca:]                        # (Hd, Ca) each
    if pad:
        w2s = jnp.pad(w2s, ((0, 0), (0, pad)))
        w2t = jnp.pad(w2t, ((0, 0), (0, pad)))
    w2_t = jnp.concatenate([w2s, w2t], axis=1).T             # (2*Ca_pad, Hd)

    b2f = b2.reshape(-1)
    b2s, b2t = b2f[:Ca], b2f[Ca:]
    if pad:
        b2s = jnp.pad(b2s, (0, pad))
        b2t = jnp.pad(b2t, (0, pad))
    b2_c = jnp.concatenate([b2s, b2t]).reshape(-1, 1)        # (2*Ca_pad, 1)

    # --- activations: NCHW stays put, spatial dims merged (free reshape) -----
    x3 = x.reshape(B, C, HW)
    y3 = y.reshape(B, Cy, HW)
    if pad:
        zc = jnp.zeros((B, pad, HW), x.dtype)
        x3p = jnp.concatenate([x3[:, :Ca], zc, x3[:, Ca:], zc], axis=1)
    else:
        x3p = x3

    # --- generation-aware tile / VMEM sizing ---------------------------------
    x_is = jnp.dtype(x.dtype).itemsize
    y_is = jnp.dtype(y.dtype).itemsize
    z_is = x_is
    logs_is = x_is                               # log_s emitted in x.dtype
    w_is = jnp.dtype(w1x.dtype).itemsize
    weight_bytes = sum(int(a.size) * w_is
                       for a in (w1x_t, w1y_t, b1_c, w2_t, b2_c))

    # VMEM bytes per unit of tile_hw: double-buffered in/out tiles + f32 temps
    # (h hidden layer, st, xa/xb/exp/zb working set).
    io_per_lane = 2 * (C_pad * x_is + Cy * y_is + C_pad * z_is + Ca_pad * logs_is)
    temps_per_lane = 4 * (Hd + 6 * Ca_pad)
    bytes_per_lane = io_per_lane + temps_per_lane

    vmem_cap = _vmem_capacity_bytes()
    # ~75% of physical VMEM (48 MiB on v7x, up to 100 MiB on v5e/v6e).
    target_budget = min(int(0.75 * vmem_cap), 100 << 20)
    tile_budget = max(target_budget - 2 * weight_bytes - (2 << 20), 1 << 20)

    if tile_hw is None:
        tile_hw = _pick_tile_hw(HW, B, bytes_per_lane=bytes_per_lane,
                                budget_bytes=tile_budget)
    assert HW % tile_hw == 0 and (tile_hw % 128 == 0 or tile_hw == HW), (
        "tile_hw must divide H*W and be lane-dense (multiple of 128) or full")

    grid = (B, HW // tile_hw)

    est_bytes = bytes_per_lane * tile_hw + 2 * weight_bytes + (2 << 20)
    vmem_limit = int(min(max(est_bytes, 16 << 20), int(0.9 * vmem_cap)))

    def tile_spec(c):
        return pl.BlockSpec((1, c, tile_hw), lambda b, s: (b, 0, s))

    def weight_spec(a):
        return pl.BlockSpec(a.shape, lambda b, s: (0, 0))

    cost = pl.CostEstimate(
        flops=int(2 * B * HW * Hd * (Ca_pad + Cy)            # layer 1
                  + 2 * B * HW * Hd * (2 * Ca_pad)),         # fused layer 2
        transcendentals=int(B * HW * (Hd + Ca_pad)),          # tanh + exp
        bytes_accessed=int(B * HW * (C_pad * x_is + Cy * y_is
                                     + C_pad * z_is + Ca_pad * logs_is)
                           + weight_bytes),
    )

    call_kwargs = dict(
        out_shape=(
            jax.ShapeDtypeStruct((B, C_pad, HW), x.dtype),
            jax.ShapeDtypeStruct((B, Ca_pad, HW), x.dtype),
        ),
        grid_spec=pltpu.PrefetchScalarGridSpec(
            num_scalar_prefetch=0,
            grid=grid,
            in_specs=[
                tile_spec(C_pad),        # x (xa + xb, padded full channel block)
                tile_spec(Cy),           # y
                weight_spec(w1x_t),      # W1x^T (Hd, Ca_pad)
                weight_spec(w1y_t),      # W1y^T (Hd, Cy)
                weight_spec(b1_c),       # b1    (Hd, 1)
                weight_spec(w2_t),       # W2^T  (2*Ca_pad, Hd), log_s/t fused
                weight_spec(b2_c),       # b2    (2*Ca_pad, 1)
            ],
            out_specs=[tile_spec(C_pad), tile_spec(Ca_pad)],
        ),
        compiler_params=pltpu.CompilerParams(
            dimension_semantics=("parallel", "parallel"),
            vmem_limit_bytes=vmem_limit),
        cost_estimate=cost,
    )
    if donate_x:
        call_kwargs["input_output_aliases"] = {0: 0}

    z3p, logs3p = pl.pallas_call(coupling_kernel, **call_kwargs)(
        x3p, y3, w1x_t, w1y_t, b1_c, w2_t, b2_c)

    if pad:
        z3 = jnp.concatenate([z3p[:, :Ca], z3p[:, Ca_pad:Ca_pad + Ca]], axis=1)
        logs3 = logs3p[:, :Ca]
    else:
        z3 = z3p
        logs3 = logs3p

    z = z3.reshape(B, C, H, W)
    log_s = logs3.reshape(B, Ca, H, W)
    return z, log_s


def _reference_forward(x, y, params):
    """Pure-JAX reference with identical semantics (for verification)."""
    w1x, w1y, b1, w2, b2 = params
    B, C, H, W = x.shape
    Ca = C // 2
    xa = x[:, :Ca].transpose(0, 2, 3, 1).reshape(-1, Ca)
    xb = x[:, Ca:].transpose(0, 2, 3, 1).reshape(-1, Ca)
    yr = y.transpose(0, 2, 3, 1).reshape(-1, y.shape[1])
    h = jnp.tanh(xa @ w1x + yr @ w1y + b1)
    out = h @ w2 + b2
    log_s, t = out[:, :Ca], out[:, Ca:]
    zb = xb * jnp.exp(log_s) + t
    to_nchw = lambda a: a.reshape(B, H, W, -1).transpose(0, 3, 1, 2)
    z = jnp.concatenate([x[:, :Ca], to_nchw(zb)], axis=1)
    return z, to_nchw(log_s)


if __name__ == "__main__":
    key = jax.random.PRNGKey(0)
    k_x, k_y, k1, k2, k3, k4 = jax.random.split(key, 6)

    B, C, H, W = 2, 4, 16, 16       # x: (2, 4, 16, 16)
    Cy = 8                          # conditioning channels
    Hd = 32                         # hidden width of F
    Ca = C // 2

    x = jax.random.normal(k_x, (B, C, H, W), dtype=jnp.float32)
    y = jax.random.normal(k_y, (B, Cy, H, W), dtype=jnp.float32)

    # Deterministic synthetic parameters for F (1x1-conv conditional net).
    w1x = 0.3 * jax.random.normal(k1, (Ca, Hd), dtype=jnp.float32)
    w1y = 0.3 * jax.random.normal(k2, (Cy, Hd), dtype=jnp.float32)
    b1 = jnp.zeros((1, Hd), dtype=jnp.float32)
    w2 = 0.3 * jax.random.normal(k3, (Hd, 2 * Ca), dtype=jnp.float32)
    b2 = 0.1 * jax.random.normal(k4, (1, 2 * Ca), dtype=jnp.float32)
    params = (w1x, w1y, b1, w2, b2)

    z, log_s = affine_coupling_forward(x, y, params)
    jax.block_until_ready((z, log_s))

    z_ref, log_s_ref = _reference_forward(x, y, params)
    assert z.shape == (B, C, H, W) and log_s.shape == (B, Ca, H, W)
    assert jnp.allclose(z, z_ref, atol=1e-5, rtol=1e-5)
    assert jnp.allclose(log_s, log_s_ref, atol=1e-5, rtol=1e-5)

    print("KERNEL_OK")
</pallas_src>

<mosaic_0001>
module attributes {stable_mosaic.version = 11 : i64} {
  func.func @coupling_kernel(%arg0: i32, %arg1: i32, %arg2: memref<1x16x128xf32, #tpu.memory_space<vmem>>, %arg3: memref<1x8x128xf32, #tpu.memory_space<vmem>>, %arg4: memref<32x8xf32, #tpu.memory_space<vmem>>, %arg5: memref<32x8xf32, #tpu.memory_space<vmem>>, %arg6: memref<32x1xf32, #tpu.memory_space<vmem>>, %arg7: memref<16x32xf32, #tpu.memory_space<vmem>>, %arg8: memref<16x1xf32, #tpu.memory_space<vmem>>, %arg9: memref<1x16x128xf32, #tpu.memory_space<vmem>>, %arg10: memref<1x8x128xf32, #tpu.memory_space<vmem>>) attributes {dimension_semantics = [#tpu.dimension_semantics<parallel>, #tpu.dimension_semantics<parallel>], iteration_bounds = array<i64: 2, 2>, scalar_prefetch = 0 : i64, scratch_operands = 0 : i64, tpu.core_type = #tpu.core_type<tc>, window_params = [{transform_indices = @transform_0, window_bounds = array<i64: 1, 16, 128>}, {transform_indices = @transform_1, window_bounds = array<i64: 1, 8, 128>}, {pipeline_mode = #tpu.pipeline_mode<synchronous>, transform_indices = @transform_2, window_bounds = array<i64: 32, 8>}, {pipeline_mode = #tpu.pipeline_mode<synchronous>, transform_indices = @transform_3, window_bounds = array<i64: 32, 8>}, {pipeline_mode = #tpu.pipeline_mode<synchronous>, transform_indices = @transform_4, window_bounds = array<i64: 32, 1>}, {pipeline_mode = #tpu.pipeline_mode<synchronous>, transform_indices = @transform_5, window_bounds = array<i64: 16, 32>}, {pipeline_mode = #tpu.pipeline_mode<synchronous>, transform_indices = @transform_6, window_bounds = array<i64: 16, 1>}, {transform_indices = @transform_7, window_bounds = array<i64: 1, 16, 128>}, {transform_indices = @transform_8, window_bounds = array<i64: 1, 8, 128>}]} {
    %c0 = arith.constant 0 : index
    %c0_0 = arith.constant 0 : index
    %c0_1 = arith.constant 0 : index
    %0 = vector.load %arg2[%c0, %c0_0, %c0_1] : memref<1x16x128xf32, #tpu.memory_space<vmem>>, vector<1x16x128xf32>
    %1 = vector.shape_cast %0 : vector<1x16x128xf32> to vector<16x128xf32>
    %c0_2 = arith.constant 0 : index
    %c0_3 = arith.constant 0 : index
    %c0_4 = arith.constant 0 : index
    %2 = vector.load %arg3[%c0_2, %c0_3, %c0_4] : memref<1x8x128xf32, #tpu.memory_space<vmem>>, vector<1x8x128xf32>
    %3 = vector.shape_cast %2 : vector<1x8x128xf32> to vector<8x128xf32>
    %4 = vector.extract_strided_slice %1 {offsets = [0, 0], sizes = [8, 128], strides = [1, 1]} : vector<16x128xf32> to vector<8x128xf32>
    %5 = vector.extract_strided_slice %1 {offsets = [8, 0], sizes = [8, 128], strides = [1, 1]} : vector<16x128xf32> to vector<8x128xf32>
    %c0_5 = arith.constant 0 : index
    %c0_6 = arith.constant 0 : index
    %6 = vector.load %arg4[%c0_5, %c0_6] : memref<32x8xf32, #tpu.memory_space<vmem>>, vector<32x8xf32>
    %cst = arith.constant dense<0.000000e+00> : vector<32x128xf32>
    %7 = tpu.matmul %6, %4, %cst {dimension_numbers = #tpu.dot_dimension_numbers<[1], [0], [0], [1], [0, 0, 1, 1], [], []>} : vector<32x8xf32>, vector<8x128xf32>, vector<32x128xf32> -> vector<32x128xf32>
    %c0_7 = arith.constant 0 : index
    %c0_8 = arith.constant 0 : index
    %8 = vector.load %arg5[%c0_7, %c0_8] : memref<32x8xf32, #tpu.memory_space<vmem>>, vector<32x8xf32>
    %cst_9 = arith.constant dense<0.000000e+00> : vector<32x128xf32>
    %9 = tpu.matmul %8, %3, %cst_9 {dimension_numbers = #tpu.dot_dimension_numbers<[1], [0], [0], [1], [0, 0, 1, 1], [], []>} : vector<32x8xf32>, vector<8x128xf32>, vector<32x128xf32> -> vector<32x128xf32>
    %10 = arith.addf %7, %9 : vector<32x128xf32>
    %c0_10 = arith.constant 0 : index
    %c0_11 = arith.constant 0 : index
    %11 = vector.load %arg6[%c0_10, %c0_11] : memref<32x1xf32, #tpu.memory_space<vmem>>, vector<32x1xf32>
    %12 = vector.broadcast %11 : vector<32x1xf32> to vector<32x128xf32>
    %13 = arith.addf %10, %12 : vector<32x128xf32>
    %14 = math.tanh %13 : vector<32x128xf32>
    %c0_12 = arith.constant 0 : index
    %c0_13 = arith.constant 0 : index
    %15 = vector.load %arg7[%c0_12, %c0_13] : memref<16x32xf32, #tpu.memory_space<vmem>>, vector<16x32xf32>
    %cst_14 = arith.constant dense<0.000000e+00> : vector<16x128xf32>
    %16 = tpu.matmul %15, %14, %cst_14 {dimension_numbers = #tpu.dot_dimension_numbers<[1], [0], [0], [1], [0, 0, 1, 1], [], []>} : vector<16x32xf32>, vector<32x128xf32>, vector<16x128xf32> -> vector<16x128xf32>
    %c0_15 = arith.constant 0 : index
    %c0_16 = arith.constant 0 : index
    %17 = vector.load %arg8[%c0_15, %c0_16] : memref<16x1xf32, #tpu.memory_space<vmem>>, vector<16x1xf32>
    %18 = vector.broadcast %17 : vector<16x1xf32> to vector<16x128xf32>
    %19 = arith.addf %16, %18 : vector<16x128xf32>
    %20 = vector.extract_strided_slice %19 {offsets = [0, 0], sizes = [8, 128], strides = [1, 1]} : vector<16x128xf32> to vector<8x128xf32>
    %21 = vector.extract_strided_slice %19 {offsets = [8, 0], sizes = [8, 128], strides = [1, 1]} : vector<16x128xf32> to vector<8x128xf32>
    %22 = math.exp %20 : vector<8x128xf32>
    %23 = arith.mulf %5, %22 : vector<8x128xf32>
    %24 = arith.addf %23, %21 : vector<8x128xf32>
    %c0_17 = arith.constant 0 : index
    %c0_18 = arith.constant 0 : index
    %c0_19 = arith.constant 0 : index
    %25 = vector.load %arg9[%c0_17, %c0_18, %c0_19] : memref<1x16x128xf32, #tpu.memory_space<vmem>>, vector<1x8x128xf32>
    %26 = vector.shape_cast %25 : vector<1x8x128xf32> to vector<8x128xf32>
    %27 = vector.shape_cast %4 : vector<8x128xf32> to vector<1x8x128xf32>
    tpu.vector_store %arg9[%c0_17, %c0_18, %c0_19], %27 {strides = array<i32>} : memref<1x16x128xf32, #tpu.memory_space<vmem>>, vector<1x8x128xf32>,
    %c0_20 = arith.constant 0 : index
    %c8 = arith.constant 8 : index
    %c0_21 = arith.constant 0 : index
    %28 = vector.load %arg9[%c0_20, %c8, %c0_21] : memref<1x16x128xf32, #tpu.memory_space<vmem>>, vector<1x8x128xf32>
    %29 = vector.shape_cast %28 : vector<1x8x128xf32> to vector<8x128xf32>
    %30 = vector.shape_cast %24 : vector<8x128xf32> to vector<1x8x128xf32>
    tpu.vector_store %arg9[%c0_20, %c8, %c0_21], %30 {strides = array<i32>} : memref<1x16x128xf32, #tpu.memory_space<vmem>>, vector<1x8x128xf32>,
    %c0_22 = arith.constant 0 : index
    %c0_23 = arith.constant 0 : index
    %c0_24 = arith.constant 0 : index
    %31 = vector.load %arg10[%c0_22, %c0_23, %c0_24] : memref<1x8x128xf32, #tpu.memory_space<vmem>>, vector<1x8x128xf32>
    %32 = vector.shape_cast %31 : vector<1x8x128xf32> to vector<8x128xf32>
    %33 = vector.shape_cast %20 : vector<8x128xf32> to vector<1x8x128xf32>
    tpu.vector_store %arg10[%c0_22, %c0_23, %c0_24], %33 {strides = array<i32>} : memref<1x8x128xf32, #tpu.memory_space<vmem>>, vector<1x8x128xf32>,
    return
  }
  func.func @transform_0(%arg0: i32, %arg1: i32) -> (i32, i32, i32) {
    %c0_i32 = arith.constant 0 : i32
    %c0_i32_0 = arith.constant 0 : i32
    return %arg0, %c0_i32, %arg1 : i32, i32, i32
  }
  func.func @transform_1(%arg0: i32, %arg1: i32) -> (i32, i32, i32) {
    %c0_i32 = arith.constant 0 : i32
    %c0_i32_0 = arith.constant 0 : i32
    return %arg0, %c0_i32, %arg1 : i32, i32, i32
  }
  func.func @transform_2(%arg0: i32, %arg1: i32) -> (i32, i32) {
    %c0_i32 = arith.constant 0 : i32
    %c0_i32_0 = arith.constant 0 : i32
    %c0_i32_1 = arith.constant 0 : i32
    return %c0_i32, %c0_i32_0 : i32, i32
  }
  func.func @transform_3(%arg0: i32, %arg1: i32) -> (i32, i32) {
    %c0_i32 = arith.constant 0 : i32
    %c0_i32_0 = arith.constant 0 : i32
    %c0_i32_1 = arith.constant 0 : i32
    return %c0_i32, %c0_i32_0 : i32, i32
  }
  func.func @transform_4(%arg0: i32, %arg1: i32) -> (i32, i32) {
    %c0_i32 = arith.constant 0 : i32
    %c0_i32_0 = arith.constant 0 : i32
    %c0_i32_1 = arith.constant 0 : i32
    return %c0_i32, %c0_i32_0 : i32, i32
  }
  func.func @transform_5(%arg0: i32, %arg1: i32) -> (i32, i32) {
    %c0_i32 = arith.constant 0 : i32
    %c0_i32_0 = arith.constant 0 : i32
    %c0_i32_1 = arith.constant 0 : i32
    return %c0_i32, %c0_i32_0 : i32, i32
  }
  func.func @transform_6(%arg0: i32, %arg1: i32) -> (i32, i32) {
    %c0_i32 = arith.constant 0 : i32
    %c0_i32_0 = arith.constant 0 : i32
    %c0_i32_1 = arith.constant 0 : i32
    return %c0_i32, %c0_i32_0 : i32, i32
  }
  func.func @transform_7(%arg0: i32, %arg1: i32) -> (i32, i32, i32) {
    %c0_i32 = arith.constant 0 : i32
    %c0_i32_0 = arith.constant 0 : i32
    return %arg0, %c0_i32, %arg1 : i32, i32, i32
  }
  func.func @transform_8(%arg0: i32, %arg1: i32) -> (i32, i32, i32) {
    %c0_i32 = arith.constant 0 : i32
    %c0_i32_0 = arith.constant 0 : i32
    return %arg0, %c0_i32, %arg1 : i32, i32, i32
  }
}

</mosaic_0001>

<bundles_post_ra>
// kernel: tpu_custom_call.1
= control target key start
LH: loop header
LB: loop body
LE: loop exit
PB: predicated region body
PF: predicated region fallthrough
CT: control target
= control target key end

     0   :  { %s1281_s0 = inlined_call_operand.vmem [shape: f32[2,16,256], index: 0, kind: input, shape index: {}]   ;;  %s1282_s1 = inlined_call_operand.vmem [shape: f32[2,8,256], index: 1, kind: input, shape index: {}]   ;;  %s1283_s2 = inlined_call_operand.vmem [shape: f32[32,8], index: 2, kind: input, shape index: {}]   ;;  %s1284_s3 = inlined_call_operand.vmem [shape: f32[32,8], index: 3, kind: input, shape index: {}]   ;;  %s1285_s4 = inlined_call_operand.vmem [shape: f32[32,1], index: 4, kind: input, shape index: {}]   ;;  %s1286_s5 = inlined_call_operand.vmem [shape: f32[16,32], index: 5, kind: input, shape index: {}]   ;;  %s1287_s6 = inlined_call_operand.vmem [shape: f32[16,1], index: 6, kind: input, shape index: {}]   ;;  %s1288_s7 = inlined_call_operand.hbm [shape: f32[2,16,256], index: 7, kind: output, shape index: {0}]   ;;  %s1289_s8 = inlined_call_operand.hbm [shape: f32[2,8,256], index: 8, kind: output, shape index: {1}]  }
   0x1   :  { %1294 = sst [smem:[#allocation14_spill]] %s1281_s0 }
   0x2   :  { %1295 = sst [smem:[#allocation15_spill]] %s1282_s1 }
   0x3   :  { %1296 = sst [smem:[#allocation16_spill]] %s1283_s2 }
   0x4   :  { %14 = vsyncpa [#allocation4], 0 }
   0x5   :  { %16 = vsyncpa [#allocation4 + $0x1], 0 }
   0x6   :  { %17 = vsyncpa [#allocation6], 0 }
   0x7   :  { %19 = vsyncpa [#allocation6 + $0x1], 0  ;;  %s1059_s27 = smov 0   ;;  %s1061_s28 = smov 0  }
   0x8   :  { %s1063_s29 = smov 0   ;;  %s1065_s30 = smov 0  }
   0x9   :  { %s1067_s9 = smov 0   ;;  %s1069_s10 = smov 0  }
   0xa   :  { %s1071_s11 = smov 0   ;;  %s1073_s12 = smov 0  }
   0xb LB: > { %1297 = sst [smem:[#allocation9_spill]] %s1000_s10  ;;  %s756_s13 = sadd.s32 4294967295, %s1008_s12   ;;  %s1008_s12 = sphi %s1073_s12, %s25_s12   ;;  %s1004_s11 = sphi %s1071_s11, %s1312_s11   ;;  %s1000_s10 = sphi %s1069_s10, %s1311_s10   ;;  %s996_s9 = sphi %s1067_s9, %s1310_s9   ;;  %s992_s30 = sphi %s1065_s30, %s1309_s30   ;;  %s988_s29 = sphi %s1063_s29, %s1315_s29   ;;  %s984_s28 = sphi %s1061_s28, %s1314_s28   ;;  %s980_s27 = sphi %s1059_s27, %s1313_s27  }
   0xc   : > { %1298 = sst [smem:[#allocation10_spill]] %s1004_s11  ;;  %s757_s14 = sadd.s32 4294967294, %s1008_s12  }
   0xd   : > { %s34_s15 = sadd.s32 1, %s1000_s10  ;;  %s37_s16 = sadd.s32 1, %s1004_s11 }
   0xe   : > { %p35_p0 = scmp.ge.s32.totalorder %s34_s15, 2  ;;  %p53_p1 = scmp.ne.s32.totalorder %s988_s29, %s984_s28 }
   0xf   : > { %p54_p2 = scmp.eq.s32.totalorder %s1008_s12, 0  ;;  %p218_p5 = scmp.eq.s32.totalorder %s756_s13, 3 }
  0x10   : > { %s1317_s15 = smov (%p35_p0, %s34_s15), 0  ;;  %s1319_s16 = smov (!%p35_p0, %s37_s16), %s1004_s11 }
  0x11   : > { %1299 = sst [smem:[#allocation11_spill]] %s1317_s15  ;;  %s42_s17 = ssub.s32 %s1000_s10, %s1317_s15 }
  0x12   : > { %p1111_p3 = por %p54_p2, %p53_p1  ;;  %p39_p4 = scmp.ge.s32.totalorder %s1319_s16, 2 }
  0x13   : > { %p223_p6 = scmp.ne.s32.totalorder %s984_s28, %s980_s27  ;;  %p224_p7 = scmp.eq.s32.totalorder %s757_s14, 3 }
  0x14   : > { %s1321_s16 = smov (%p39_p4, %s1319_s16), 0  ;;  %p1119_p8 = por %p218_p5, %p53_p1 }
  0x15   : > { %1301 = sst [smem:[#allocation12_spill]] %s1321_s16  ;;  %p1123_p9 = por %p224_p7, %p223_p6 }
  0x16   : > { %s41_s21 = ssub.s32 %s1004_s11, %s1321_s16  ;;  %s46_s23 = sadd.s32 1, %s988_s29 }
  0x17   : > { %s43_s22 = sor.u32 %s42_s17, %s41_s21  ;;  %p759_p11 = scmp.ge.s32.totalorder %s1008_s12, 4 }
  0x18   : > { %p44_p10 = scmp.eq.s32.totalorder %s43_s22, 0 }
  0x19   : > { %283 = sbr.rel (%p759_p11) target bundleno = 42 (0x2a), region = 36 }
  0x1a   : > { %s1131_s24 = scalar_select %p44_p10, %s988_s29, %s46_s23  }
  0x1c   : > { %1304 = sst [smem:[#allocation13_spill]] %s1131_s24 }
  0x1e   : > { %286 = sbr.rel (!%p1111_p3) target bundleno = 42 (0x2a), region = 40  ;;  %s288_s25 = sand.u32 (%p1111_p3), 1, %s988_s29  }
  0x1f   : > { %s761_s26 = sshll.u32 (%p1111_p3), %s1004_s11, 2  ;;  %s760_s13 = sshll.u32 (%p1111_p3), %s288_s25, 4 }
  0x20   : > { %s292_s14 = sadd.s32 (%p1111_p3), %s1000_s10, %s761_s26  ;;  %s1305_s0 = sld [smem:[#allocation14_spill]] (%p1111_p3) }
  0x21   : > { %s762_s15 = sshll.u32 (%p1111_p3), %s292_s14, 3  ;;  %s290_s22 = scalar_lea.vmem (%p1111_p3), [#allocation2], %s760_s13 }
  0x26   : > { %s294_s21 = scalar_lea.vmem %s1305_s0, %s762_s15 }
  0x27   : > { %v325_v0 = vld [vmem:[%s294_s21] sm:$0xff]  ;;  %v327_v1 = vld [vmem:[%s294_s21 + $0x10] sm:$0xff] }
  0x28   : > { %326 = vst [vmem:[%s290_s22] sm:$0xff] %v325_v0 }
  0x29   : > { %328 = vst [vmem:[%s290_s22 + $0x8] sm:$0xff] %v327_v1 }
  0x2a PF: > { %p763_p12 = scmp.ge.s32.totalorder %s1008_s12, 1  ;;  %p344_p13 = scmp.lt.s32.totalorder %s1008_s12, 5 }
  0x2c   : > { %p345_p0 = pnand %p763_p12, %p344_p13 }
  0x2d   : > { %p397_p1 = scmp.lt.s32.totalorder (!%p345_p0), %s996_s9, 1  ;;  %p399_p2 = scmp.lt.s32.totalorder (!%p345_p0), %s992_s30, 1 }
  0x2e   : > { %348 = sbr.rel (%p345_p0) target bundleno = 378 (0x17a), region = 82  ;;  %s1147_s15 = sand.u32 (!%p345_p0), 1, %s984_s28  }
  0x2f   : > { %s764_s17 = sshll.u32 (!%p345_p0), %s1147_s15, 4  ;;  %s1306_s2 = sld [smem:[#allocation16_spill]] (!%p345_p0) }
  0x30   : > { %s1161_s10 = scalar_lea.vmem (!%p345_p0), [#allocation2], %s764_s17  ;;  %s1307_s1 = sld [smem:[#allocation15_spill]] (!%p345_p0) }
  0x31   : > { %s783_s0 = sshll.u32 (!%p345_p0), %s996_s9, 1  ;;  %s781_s22 = sshll.u32 (!%p345_p0), %s996_s9, 2 }
  0x32   : > { %s588_s26 = scalar_lea.sflag (!%p345_p0), [#allocation6], %s1147_s15 }
  0x33   : > { %s398_s16 = scalar_select %p397_p1, %s996_s9, 1  ;;  %v1010_v2 = vmov 0   ;;  %v502_v3 = vld [vmem:[%s1285_s4 + $0x18] sm:$0xff]  ;;  %v500_v4 = vld [vmem:[%s1285_s4 + $0x8] sm:$0xff]  ;;  %v405_v6 = vld [vmem:[%s1161_s10] sm:$0xff]  ;;  %vm416_vm0 = vcmask 64512  }
  0x34   : > { %870 = vset.pattern.permute.xlu1 %v1010_v2  ;;  %869 = vset.pattern.permute.xlu0 %v1010_v2  ;;  %s400_s13 = scalar_select %p399_p2, %s992_s30, 1  ;;  %v413_v7 = vld [vmem:[%s1284_s3 + $0x8] sm:$0xff]  ;;  %v412_v8 = vld [vmem:[%s1284_s3] sm:$0xff]  ;;  %v501_v10 = vld [vmem:[%s1285_s4 + $0x10] sm:$0xff]  ;;  %vm545_vm1 = vcmask 261120  }
  0x35   : > { %520 = vperm.xlu0 %869, %v502_v3   ;;  %510 = vperm.xlu1 %870, %v500_v4   ;;  %s767_s14 = sshll.u32 %s398_s16, 1  ;;  %v409_v5 = vld [vmem:[%s1306_s2 + $0x8] sm:$0xff]  ;;  %s1170_s16 = scalar_lea.vmem [#allocation3], %s764_s17  ;;  %v499_v11 = vld [vmem:[%s1285_s4] sm:$0xff]  ;;  %v410_v12 = vld [vmem:[%s1306_s2 + $0x10] sm:$0xff] }
  0x36   : > { %871 = vset.pattern.permute.xlu2 %v1010_v2  ;;  %s402_s21 = sadd.s32 %s767_s14, %s400_s13  ;;  %788 = vmatpush.msra.mxu1 %v405_v6  ;;  %579 = vst [vmem:[%s1170_s16] sm:$0xff] %v405_v6  ;;  %v414_v13 = vld [vmem:[%s1284_s3 + $0x10] sm:$0xff]  ;;  %v408_v14 = vld [vmem:[%s1306_s2] sm:$0xff]  ;;  %v411_v15 = vld [vmem:[%s1306_s2 + $0x18] sm:$0xff]  ;;  %s616_s13 = sadd.s32 %s992_s30, %s783_s0 }
  0x37   : > { %s768_s11 = sshll.u32 %s402_s21, 3  ;;  %774 = vmatmul.msk.f32.vlgmr.msra.gmra.mxu1 %vm416_vm0, %v409_v5  ;;  %v415_v16 = vld [vmem:[%s1284_s3 + $0x18] sm:$0xff]  ;;  %v533_v23 = vld [vmem:[%s1287_s6] sm:$0xff]  ;;  %v534_v32 = vld [vmem:[%s1287_s6 + $0x8] sm:$0xff]  ;;  %s784_s14 = sshll.u32 %s616_s13, 3 }
  0x38   : > { %s404_s25 = scalar_lea.vmem %s1307_s1, %s768_s11  ;;  %537 = vperm.xlu2 %871, %v533_v23   ;;  %v531_v42 = vld [vmem:[%s1286_s5] sm:$0xff]  ;;  %v532_v44 = vld [vmem:[%s1286_s5 + $0x8] sm:$0xff]  ;;  %s766_s21 = sshll.u32 %s1147_s15, 3 }
  0x39   : > { %v407_v9 = vld [vmem:[%s404_s25] sm:$0xff]  ;;  %s618_s17 = scalar_lea.hbm %s1289_s8, %s784_s14  ;;  %s396_s18 = scalar_lea.vmem [#allocation5], %s766_s21 }
  0x3a   : > { %787 = vmatpush.msra.mxu3 %v407_v9  ;;  %444 = vmatpush.msra.mxu0 %v407_v9  ;;  %s620_s23 = sshll.u32 %s396_s18, 4  ;;  %s622_s1 = sshll.u32 %s618_s17, 4  ;;  %s621_s23 = int_to_ptr.vmem [resolvable:$true] %s620_s23  ;;  %s623_s1 = int_to_ptr.hbm [resolvable:$true] %s622_s1 }
  0x3b   : > { %770 = vmatmul.msk.f32.vlgmr.msra.gmra.mxu3 %vm416_vm0, %v413_v7  ;;  %769 = vmatmul.msk.f32.vlgmr.msra.gmra.mxu0 %vm416_vm0, %v412_v8  ;;  %s598_s2 = sadd.s32 %s992_s30, %s781_s22  ;;  %s896_s0 = sshra.s32 %s623_s1, 4  ;;  %s897_s0 = int_to_ptr.hbm [resolvable:$true] %s896_s0 }
  0x3c   : > { %485 = vmatpush.msrb.mxu0 %v405_v6  ;;  %s782_s25 = sshll.u32 %s598_s2, 3  ;;  %s898_s13 = scalar_lea.hbm %s897_s0, 8 }
  0x3d   : > { %515 = vperm.xlu0 %869, %v501_v10   ;;  %505 = vperm.xlu1 %870, %v499_v11   ;;  %p899_p3 = scmp.ne.s32.totalorder %s897_s0, %s898_s13  ;;  %s902_s21 = scalar_lea.hbm %s1289_s8, 32 }
  0x3e   : > { %p903_p6 = scmp.lt.s32.totalorder %s897_s0, %s1289_s8  ;;  %p904_p7 = scmp.lt.s32.totalorder %s902_s21, %s898_s13 }
  0x3f   : > { %775 = vmatmul.msk.f32.gmra.mxu1 %vm416_vm0, %v410_v12  ;;  %p900_p4 = pnand %p899_p3, %p1119_p8 }
  0x40   : > { %542 = vperm.xlu2 %871, %v534_v32   ;;  %p905_p10 = por %p904_p7, %p903_p6 }
  0x41   : > { %p901_p5 = pneg %p900_p4 }
  0x43   : > { %771 = vmatmul.msk.f32.gmra.mxu3 %vm416_vm0, %v414_v13  ;;  %773 = vmatmul.msk.f32.vlgmr.msrb.gmra.mxu0 %vm416_vm0, %v408_v14  ;;  %p906_p11 = pnand %p905_p10, %p901_p5 }
  0x47   : > { %776 = vmatmul.msk.f32.gmra.mxu1 %vm416_vm0, %v411_v15 }
  0x4b   : > { %772 = vmatmul.msk.f32.gmra.mxu3 %vm416_vm0, %v415_v16 }
  0x92   : > { %v538_v45 = vpop.permute.xlu2 %537 }
  0xa7   : > { %v521_v20 = vpop.permute.xlu0 %520  ;;  %v511_v24 = vpop.permute.xlu1 %510 }
  0xaf   : > { %v516_v27 = vpop.permute.xlu0 %515  ;;  %v506_v36 = vpop.permute.xlu1 %505 }
  0xb4   : > { %v490_v17 = vpop.f32.mrf.mxu1 }
  0xb8   : > { %v446_v21 = vpop.f32.mrf.mxu0 }
  0xbc   : > { %v493_v19 = vpop.f32.mrf.mxu1 }
  0xbe   : > { %v449_v18 = vpop.f32.mrf.mxu3 }
  0xbf   : > { %v491_v30 = vadd.f32 %v490_v17, %v449_v18 }
  0xc0   : > { %v487_v28 = vpop.f32.mrf.mxu0 }
  0xc1   : > { %v488_v34 = vadd.f32 %v487_v28, %v446_v21  ;;  %v524_v37 = vadd.f32 %v511_v24, %v491_v30 }
  0xc3   : > { %v523_v38 = vadd.f32 %v506_v36, %v488_v34 }
  0xc4   : > { %v496_v25 = vpop.f32.mrf.mxu1 }
  0xc6   : > { %v452_v22 = vpop.f32.mrf.mxu3 }
  0xc7   : > { %v494_v26 = vadd.f32 %v493_v19, %v452_v22 }
  0xc9   : > { %v525_v33 = vadd.f32 %v516_v27, %v494_v26 }
  0xce   : > { %v455_v29 = vpop.f32.mrf.mxu3 }
  0xcf   : > { %v497_v31 = vadd.f32 %v496_v25, %v455_v29 }
  0xd1   : > { %v526_v35 = vadd.f32 %v521_v20, %v497_v31 }
  0xd3   : > { %872 = vtanh.f32 %v526_v35 }
  0xd4   : > { %874 = vtanh.f32 %v525_v33 }
  0xd5   : > { %876 = vtanh.f32 %v524_v37 }
  0xd6   : > { %878 = vtanh.f32 %v523_v38 }
  0xd9   : > { %v873_v39 = vpop.eup %872 }
  0xda   : > { %564 = vmatpush.msra.mxu2 %v873_v39  ;;  %v875_v40 = vpop.eup %874 }
  0xdb   : > { %v877_v41 = vpop.eup %876 }
  0xdc   : > { %565 = vmatpush.msra.mxu2 %v875_v40  ;;  %v879_v43 = vpop.eup %878 }
  0xde   : > { %566 = vmatpush.msra.mxu2 %v877_v41 }
  0xe0   : > { %567 = vmatpush.msra.mxu2 %v879_v43 }
  0xe1   : > { %777 = vmatmul.msk.f32.vlgmr.msra.gmra.mxu2 %vm545_vm1, %v531_v42 }
  0xe9   : > { %778 = vmatmul.msk.f32.gmra.mxu2 %vm545_vm1, %v532_v44 }
 0x164   : > { %v569_v46 = vpop.f32.mrf.mxu2 }
 0x165   : > { %v570_v47 = vadd.f32 %v569_v46, %v538_v45 }
 0x167   : > { %v575_v48 = vmul.f32 1.442695, %v570_v47  ;;  %581 = vst [vmem:[%s396_s18] sm:$0xff] %v570_v47 }
 0x168   : > { %909 = shalt.err (!%p906_p11)
}
 0x169   : > { %790 = dma.vmem_to_hbm [thread:$0]  (%p1119_p8), %s621_s23, 128, %s623_s1, %s588_s26   ;;  %880 = vpow2.f32 %v575_v48  ;;  %v406_v49 = vld [vmem:[%s1161_s10 + $0x8] sm:$0xff]  ;;  %v543_v52 = vpop.permute.xlu2 %542 }
 0x16a   : > { %s600_s17 = scalar_lea.hbm %s1288_s7, %s782_s25  ;;  %s601_s22 = sshll.u32 %s1170_s16, 4  ;;  %s602_s22 = int_to_ptr.vmem [resolvable:$true] %s601_s22 }
 0x16b   : > { %s603_s18 = sshll.u32 %s600_s17, 4  ;;  %s583_s0 = scalar_lea.sflag [#allocation4], %s1147_s15  ;;  %s604_s18 = int_to_ptr.hbm [resolvable:$true] %s603_s18 }
 0x16c   : > { %v572_v50 = vpop.f32.mrf.mxu2  ;;  %s924_s1 = sshra.s32 %s604_s18, 4  ;;  %s930_s26 = scalar_lea.hbm %s1288_s7, 64  ;;  %s925_s1 = int_to_ptr.hbm [resolvable:$true] %s924_s1 }
 0x16d   : > { %v573_v53 = vadd.f32 %v572_v50, %v543_v52  ;;  %s926_s23 = scalar_lea.hbm %s925_s1, 16  ;;  %p931_p1 = scmp.lt.s32.totalorder %s925_s1, %s1288_s7 }
 0x16e   : > { %p927_p12 = scmp.ne.s32.totalorder %s925_s1, %s926_s23  ;;  %p932_p2 = scmp.lt.s32.totalorder %s930_s26, %s926_s23 }
 0x16f   : > { %v881_v51 = vpop.eup %880 }
 0x170   : > { %v577_v54 = vmul.f32 %v881_v51, %v406_v49  ;;  %p928_p13 = pnand %p927_p12, %p1119_p8  ;;  %p933_p3 = por %p932_p2, %p931_p1 }
 0x172   : > { %v578_v55 = vadd.f32 %v577_v54, %v573_v53  ;;  %p929_p0 = pneg %p928_p13 }
 0x174   : > { %580 = vst [vmem:[%s1170_s16 + $0x8] sm:$0xff] %v578_v55  ;;  %p934_p4 = pnand %p933_p3, %p929_p0 }
 0x176   : > { %937 = shalt.err (!%p934_p4)
}
 0x177   : > { %s1011_s15 = smov 128   ;;  %s1012_s16 = smov 256  }
 0x178   : > { %s1013_s14 = smov 8  }
 0x179   : > { %789 = dma.vmem_to_hbm [thread:$0]  (%p1119_p8), %s602_s22, 256, %s604_s18, %s583_s0, %s1011_s15, %s1012_s16, %s1013_s14  }
 0x17a PF: > { %p800_p5 = scmp.ge.s32.totalorder %s1008_s12, 2  ;;  %s634_s21 = sand.u32 1, %s980_s27  }
 0x17b   : > { %s635_s11 = scalar_lea.sflag [#allocation4], %s634_s21 }
 0x17c   : > { %p794_p6 = pnand %p800_p5, %p1123_p9 }
 0x17e   : > { %p795_p7 = pneg %p794_p6 }
 0x180   : > { %971 = dma.done.wait (%p795_p7), %s635_s11, 256  }
 0x181   : > { %973 = vsyncadd (%p795_p7), %s635_s11, 4294967040  ;;  %s645_s30 = scalar_lea.sflag [#allocation6], %s634_s21 }
 0x182   : > { %975 = dma.done.wait (%p795_p7), %s645_s30, 128  }
 0x183   : > { %977 = vsyncadd (%p795_p7), %s645_s30, 4294967168  ;;  %s25_s12 = sadd.s32 1, %s1008_s12   ;;  %s1308_s19 = sld [smem:[#allocation13_spill]] }
 0x184   : > { %p22_p10 = scmp.ge.s32.totalorder %s25_s12, 6   ;;  %s1309_s30 = sld [smem:[#allocation9_spill]] }
 0x185   : > { %s1310_s9 = sld [smem:[#allocation10_spill]]  ;;  %s1313_s27 = smov %s984_s28 }
 0x186   : > { %s1311_s10 = sld [smem:[#allocation11_spill]]  ;;  %s1314_s28 = smov %s988_s29 }
 0x187   : > { %s1312_s11 = sld [smem:[#allocation12_spill]]  ;;  %24 = sbr.rel (!%p22_p10) target bundleno = 11 (0xb), region = 146 }
 0x189   : > { %s1315_s29 = smov %s1308_s19 }
 0x18c   :  { %651 = vsyncpa [#allocation4], 1 }
 0x18d   :  { %653 = vsyncpa [#allocation4 + $0x1], 1 }
 0x18e   :  { %654 = vsyncpa [#allocation6], 1 }
 0x18f   :  { %656 = vsyncpa [#allocation6 + $0x1], 1 }

</bundles_post_ra>
